<compile_context>
chip_gen: v6e
topology: v6e:2x2x1
jax: 0.10.0
libtpu: 0.0.40
codegen_flags: <defaults>
</compile_context>

<pallas_src>
import functools

import jax
import jax.numpy as jnp
from jax.experimental import pallas as pl
from jax.experimental.pallas import tpu as pltpu


def _pick_tile_n(n, batch, max_tile=16384):
    """Largest multiple of 128 dividing n that is <= max_tile.
    When batch == 1, cap at n//2 so the (parallel) grid keeps >= 2 steps (v7x)."""
    if n % 128 != 0:
        return n  # safety fallback; caller pads N to a multiple of 128
    cap = min(n, max_tile)
    if batch == 1:
        cap = min(cap, max(n // 2, 128))
    best = 128
    t = 128
    while t <= cap:
        if n % t == 0:
            best = t
        t += 128
    return best


def _standardize(x, feat_dim, n_valid, tile_n):
    """Per-pixel (per-lane) standardization over the feature (sublane) axis.
    Single-pass moments (sum, sum-of-squares); unbiased std (ddof=1) like torch.
    If n_valid is not None, padded lanes (global col >= n_valid) are forced to 0."""
    s1 = jnp.sum(x, axis=0, keepdims=True)                  # (1, tn)
    s2 = jnp.sum(x * x, axis=0, keepdims=True)              # (1, tn)
    mean = s1 * (1.0 / feat_dim)
    var = (s2 - s1 * mean) * (1.0 / (feat_dim - 1))
    if n_valid is not None:
        col = (jax.lax.broadcasted_iota(jnp.int32, (1, tile_n), 1)
               + pl.program_id(1) * tile_n)
        valid = col < n_valid
        var = jnp.where(valid, var, 1.0)
        return jnp.where(valid, (x - mean) * jax.lax.rsqrt(var), 0.0)
    # rsqrt(0) -> inf for constant pixels; matches torch's x / 0 behavior.
    return (x - mean) * jax.lax.rsqrt(var)


# ----------------------------------------------------------------------------
# Pass 1: fused per-pixel standardization + Gram accumulation  G = Y @ Y^T.
# Block (F, tn): features on sublanes, pixels on lanes.  Output (F, F) block is
# resident across the N reduction axis (same block index), init'd with pl.when.
# ----------------------------------------------------------------------------
def _gram_kernel(x_ref, g_ref, *, feat_dim, n_valid, tile_n):
    @pl.when(pl.program_id(1) == 0)
    def _():
        g_ref[...] = jnp.zeros_like(g_ref)

    y = _standardize(x_ref[...], feat_dim, n_valid, tile_n)  # (F, tn)
    # G += Y @ Y^T : contract over the lane (pixel) axis of both operands (MXU).
    g_ref[...] += jax.lax.dot_general(
        y, y, (((1,), (1,)), ((), ())), preferred_element_type=jnp.float32)


# ----------------------------------------------------------------------------
# Pass 2: standardize on the fly + project onto the top-k eigenvectors.
# xr^T tile = V_k^T @ Y  : (k, F) @ (F, tn) -> lane-dense (k, tn) output that is
# already the final (B, out_dim, H, W) memory layout (reshape only afterwards).
# ----------------------------------------------------------------------------
def _project_kernel(x_ref, vt_ref, o_ref, *, feat_dim, n_valid, tile_n):
    y = _standardize(x_ref[...], feat_dim, n_valid, tile_n)  # (F, tn)
    o_ref[...] = jnp.dot(vt_ref[...], y, preferred_element_type=jnp.float32)


def spix_feature_projection(x, out_dim, *, max_tile_n=16384):
    """x: (B, F, H, W) float32 -> (B, out_dim, H, W) float32."""
    B, F, H, W = x.shape
    N = H * W
    assert 1 <= out_dim <= min(F, N), "out_dim must be <= min(feature dim, H*W)"
    assert F >= 2, "unbiased std (ddof=1) requires at least 2 features"

    # 'b f h w -> b f (h w)' is a free reshape (no HBM transpose pass).
    x_bfn = x.reshape(B, F, N).astype(jnp.float32)

    # Pad the pixel axis to a multiple of 128 so all lane loads/stores are dense.
    n_pad = ((N + 127) // 128) * 128
    if n_pad != N:
        x_bfn = jnp.pad(x_bfn, ((0, 0), (0, 0), (0, n_pad - N)))
        n_valid = N
    else:
        n_valid = None

    tn = _pick_tile_n(n_pad, B, max_tile_n)
    n_steps = n_pad // tn

    # ---- Pass 1: streaming Gram matrix -------------------------------------
    gram = pl.pallas_call(
        functools.partial(_gram_kernel, feat_dim=F, n_valid=n_valid, tile_n=tn),
        out_shape=jax.ShapeDtypeStruct((B, F, F), jnp.float32),
        grid=(B, n_steps),
        in_specs=[pl.BlockSpec((None, F, tn), lambda b, n: (b, 0, n))],
        out_specs=pl.BlockSpec((None, F, F), lambda b, n: (b, 0, 0)),
        compiler_params=pltpu.CompilerParams(
            dimension_semantics=("parallel", "arbitrary")),
    )(x_bfn)

    # ---- Glue: tiny (F, F) eigendecomposition ------------------------------
    # TODO(synk): torch.linalg.svd / eigh have no Pallas equivalent (iterative
    # factorization); the FxF eigh runs in plain JAX.  From X_std = U S Vh,
    # U_k @ diag(S_k) == X_std @ V_k exactly, where V_k are the eigenvectors of
    # G = X_std^T X_std with the k largest eigenvalues.  Per-vector sign may
    # differ from torch (SVD/eig is only unique up to sign).
    _, evecs = jnp.linalg.eigh(gram)                   # eigenvalues ascending
    v_k = evecs[:, :, ::-1][:, :, :out_dim]            # (B, F, k) top-k, descending
    vt_k = jnp.swapaxes(v_k, 1, 2)                     # (B, k, F)

    # ---- Pass 2: streaming projection (final layout produced directly) -----
    xr_kn = pl.pallas_call(
        functools.partial(_project_kernel, feat_dim=F, n_valid=n_valid, tile_n=tn),
        out_shape=jax.ShapeDtypeStruct((B, out_dim, n_pad), jnp.float32),
        grid=(B, n_steps),
        in_specs=[
            pl.BlockSpec((None, F, tn), lambda b, n: (b, 0, n)),
            pl.BlockSpec((None, out_dim, F), lambda b, n: (b, 0, 0)),
        ],
        out_specs=pl.BlockSpec((None, out_dim, tn), lambda b, n: (b, 0, n)),
        compiler_params=pltpu.CompilerParams(
            dimension_semantics=("parallel", "parallel")),
    )(x_bfn, vt_k)

    if n_pad != N:
        xr_kn = xr_kn[:, :, :N]
    # 'b k (h w) -> b k h w' is a free reshape.
    return xr_kn.reshape(B, out_dim, H, W)


if __name__ == "__main__":
    key = jax.random.PRNGKey(0)
    B, F, H, W = 2, 8, 16, 16
    out_dim = 4

    x = jax.random.normal(key, (B, F, H, W), dtype=jnp.float32)

    xr = spix_feature_projection(x, out_dim)
    xr = jax.block_until_ready(xr)

    assert xr.shape == (B, out_dim, H, W), xr.shape
    assert xr.dtype == jnp.float32
    assert bool(jnp.all(jnp.isfinite(xr)))

    # Pure-JAX reference following the PyTorch module verbatim (sign-invariant check).
    x_bnf = jnp.transpose(x, (0, 2, 3, 1)).reshape(B, H * W, F)
    xm = x_bnf - jnp.mean(x_bnf, axis=-1, keepdims=True)
    xs = xm / jnp.std(xm, axis=-1, keepdims=True, ddof=1)
    U, Sref, _ = jnp.linalg.svd(xs, full_matrices=False)
    ref = U[:, :, :out_dim] * Sref[:, None, :out_dim]                  # (B, N, k)
    ref = jnp.transpose(ref.reshape(B, H, W, out_dim), (0, 3, 1, 2))   # (B, k, H, W)

    out_flat = xr.reshape(B, out_dim, -1)
    ref_flat = ref.reshape(B, out_dim, -1)
    sgn = jnp.sign(jnp.sum(out_flat * ref_flat, axis=-1, keepdims=True))
    sgn = jnp.where(sgn == 0, 1.0, sgn)
    assert bool(jnp.allclose(out_flat, sgn * ref_flat, atol=3e-2, rtol=5e-3))

    print("KERNEL_OK")
</pallas_src>

<mosaic_0001>
module attributes {stable_mosaic.version = 11 : i64} {
  func.func @_gram_kernel(%arg0: i32, %arg1: i32, %arg2: memref<1x8x256xf32, #tpu.memory_space<vmem>>, %arg3: memref<1x8x8xf32, #tpu.memory_space<vmem>>) attributes {dimension_semantics = [#tpu.dimension_semantics<parallel>, #tpu.dimension_semantics<arbitrary>], iteration_bounds = array<i64: 2, 1>, scalar_prefetch = 0 : i64, scratch_operands = 0 : i64, tpu.core_type = #tpu.core_type<tc>, window_params = [{transform_indices = @transform_0, window_bounds = array<i64: 1, 8, 256>}, {transform_indices = @transform_1, window_bounds = array<i64: 1, 8, 8>}]} {
    %c0_i32 = arith.constant 0 : i32
    %0 = arith.cmpi eq, %arg1, %c0_i32 : i32
    %1 = arith.extui %0 : i1 to i32
    %c0_i32_0 = arith.constant 0 : i32
    %2 = arith.cmpi ne, %1, %c0_i32_0 : i32
    scf.if %2 {
      %cst_13 = arith.constant 0.000000e+00 : f32
      %28 = vector.broadcast %cst_13 : f32 to vector<8x8xf32>
      %c0_14 = arith.constant 0 : index
      %c0_15 = arith.constant 0 : index
      %c0_16 = arith.constant 0 : index
      %29 = vector.load %arg3[%c0_14, %c0_15, %c0_16] : memref<1x8x8xf32, #tpu.memory_space<vmem>>, vector<1x8x8xf32>
      %30 = vector.shape_cast %29 : vector<1x8x8xf32> to vector<8x8xf32>
      %31 = vector.shape_cast %28 : vector<8x8xf32> to vector<1x8x8xf32>
      tpu.vector_store %arg3[%c0_14, %c0_15, %c0_16], %31 {strides = array<i32>} : memref<1x8x8xf32, #tpu.memory_space<vmem>>, vector<1x8x8xf32>,
    } else {
    }
    %c0 = arith.constant 0 : index
    %c0_1 = arith.constant 0 : index
    %c0_2 = arith.constant 0 : index
    %3 = vector.load %arg2[%c0, %c0_1, %c0_2] : memref<1x8x256xf32, #tpu.memory_space<vmem>>, vector<1x8x256xf32>
    %4 = vector.shape_cast %3 : vector<1x8x256xf32> to vector<8x256xf32>
    %cst = arith.constant dense<0.000000e+00> : vector<256xf32>
    %5 = vector.multi_reduction <add>, %4, %cst [0] : vector<8x256xf32> to vector<256xf32>
    %6 = vector.shape_cast %5 : vector<256xf32> to vector<1x256xf32>
    %7 = arith.mulf %4, %4 : vector<8x256xf32>
    %cst_3 = arith.constant dense<0.000000e+00> : vector<256xf32>
    %8 = vector.multi_reduction <add>, %7, %cst_3 [0] : vector<8x256xf32> to vector<256xf32>
    %9 = vector.shape_cast %8 : vector<256xf32> to vector<1x256xf32>
    %cst_4 = arith.constant 1.250000e-01 : f32
    %10 = vector.broadcast %cst_4 : f32 to vector<1x256xf32>
    %11 = arith.mulf %6, %10 : vector<1x256xf32>
    %12 = arith.mulf %6, %11 : vector<1x256xf32>
    %13 = arith.subf %9, %12 : vector<1x256xf32>
    %cst_5 = arith.constant 0.142857149 : f32
    %14 = vector.broadcast %cst_5 : f32 to vector<1x256xf32>
    %15 = arith.mulf %13, %14 : vector<1x256xf32>
    %16 = vector.broadcast %11 : vector<1x256xf32> to vector<8x256xf32>
    %17 = arith.subf %4, %16 : vector<8x256xf32>
    %18 = math.rsqrt %15 : vector<1x256xf32>
    %19 = vector.broadcast %18 : vector<1x256xf32> to vector<8x256xf32>
    %20 = arith.mulf %17, %19 : vector<8x256xf32>
    %c0_6 = arith.constant 0 : index
    %c0_7 = arith.constant 0 : index
    %c0_8 = arith.constant 0 : index
    %21 = vector.load %arg3[%c0_6, %c0_7, %c0_8] : memref<1x8x8xf32, #tpu.memory_space<vmem>>, vector<1x8x8xf32>
    %22 = vector.shape_cast %21 : vector<1x8x8xf32> to vector<8x8xf32>
    %cst_9 = arith.constant dense<0.000000e+00> : vector<8x8xf32>
    %23 = tpu.matmul %20, %20, %cst_9 {dimension_numbers = #tpu.dot_dimension_numbers<[1], [1], [0], [0], [0, 0, 1, 0], [], []>} : vector<8x256xf32>, vector<8x256xf32>, vector<8x8xf32> -> vector<8x8xf32>
    %24 = arith.addf %22, %23 : vector<8x8xf32>
    %c0_10 = arith.constant 0 : index
    %c0_11 = arith.constant 0 : index
    %c0_12 = arith.constant 0 : index
    %25 = vector.load %arg3[%c0_10, %c0_11, %c0_12] : memref<1x8x8xf32, #tpu.memory_space<vmem>>, vector<1x8x8xf32>
    %26 = vector.shape_cast %25 : vector<1x8x8xf32> to vector<8x8xf32>
    %27 = vector.shape_cast %24 : vector<8x8xf32> to vector<1x8x8xf32>
    tpu.vector_store %arg3[%c0_10, %c0_11, %c0_12], %27 {strides = array<i32>} : memref<1x8x8xf32, #tpu.memory_space<vmem>>, vector<1x8x8xf32>,
    return
  }
  func.func @transform_0(%arg0: i32, %arg1: i32) -> (i32, i32, i32) {
    %c0_i32 = arith.constant 0 : i32
    %c0_i32_0 = arith.constant 0 : i32
    return %arg0, %c0_i32, %arg1 : i32, i32, i32
  }
  func.func @transform_1(%arg0: i32, %arg1: i32) -> (i32, i32, i32) {
    %c0_i32 = arith.constant 0 : i32
    %c0_i32_0 = arith.constant 0 : i32
    %c0_i32_1 = arith.constant 0 : i32
    return %arg0, %c0_i32, %c0_i32_0 : i32, i32, i32
  }
}

</mosaic_0001>

<bundles_post_ra>
// kernel: tpu_custom_call.1
= control target key start
LH: loop header
LB: loop body
LE: loop exit
PB: predicated region body
PF: predicated region fallthrough
CT: control target
= control target key end

     0   :  { %6 = vsyncpa [#allocation3], 0  ;;  %s721_s0 = inlined_call_operand.hbm [shape: f32[2,8,256], index: 0, kind: input, shape index: {}]   ;;  %s722_s1 = inlined_call_operand.hbm [shape: f32[2,8,8], index: 1, kind: output, shape index: {}]  }
   0x1   :  { %8 = vsyncpa [#allocation3 + $0x1], 0 }
   0x2   :  { %9 = vsyncpa [#allocation4], 0 }
   0x3   :  { %11 = vsyncpa [#allocation4 + $0x1], 0  ;;  %s572_s6 = smov 0   ;;  %s574_s7 = smov 0  }
   0x4   :  { %s576_s8 = smov 0   ;;  %s578_s9 = smov 0  }
   0x5   :  { %s580_s10 = smov 0   ;;  %s582_s11 = smov 0  }
   0x6 LB: > { %s367_s12 = sadd.s32 4294967295, %s557_s11   ;;  %s368_s13 = sadd.s32 4294967294, %s557_s11   ;;  %s557_s11 = sphi %s582_s11, %s17_s11   ;;  %s553_s10 = sphi %s580_s10, %s734_s10   ;;  %s549_s9 = sphi %s578_s9, %s733_s9   ;;  %s545_s8 = sphi %s576_s8, %s732_s8   ;;  %s541_s7 = sphi %s574_s7, %s731_s7   ;;  %s537_s6 = sphi %s572_s6, %s730_s6  }
   0x7   : > { %s29_s14 = sadd.s32 1, %s553_s10  ;;  %s38_s15 = sadd.s32 1, %s545_s8 }
   0x8   : > { %p31_p0 = scmp.ge.s32.totalorder %s29_s14, 2  ;;  %p45_p1 = scmp.ne.s32.totalorder %s545_s8, %s541_s7 }
   0x9   : > { %p46_p2 = scmp.eq.s32.totalorder %s557_s11, 0  ;;  %p51_p3 = scmp.ne.s32.totalorder %s541_s7, %s537_s6 }
   0xa   : > { %s736_s14 = smov (%p31_p0, %s29_s14), 0  ;;  %p52_p5 = scmp.eq.s32.totalorder %s367_s12, 0 }
   0xb   : > { %p613_p4 = por %p46_p2, %p45_p1  ;;  %s33_s17 = ssub.s32 %s553_s10, %s736_s14 }
   0xc   : > { %p75_p6 = scmp.eq.s32.totalorder %s367_s12, 1  ;;  %p36_p7 = scmp.eq.s32.totalorder %s33_s17, 0 }
   0xd   : > { %p619_p8 = por %p52_p5, %p51_p3  ;;  %p81_p10 = scmp.eq.s32.totalorder %s368_s13, 1 }
   0xe   : > { %p623_p9 = por %p75_p6, %p45_p1  ;;  %p394_p13 = scmp.lt.s32.totalorder %s557_s11, 2 }
   0xf   : > { %s628_s20 = scalar_select %p36_p7, %s545_s8, %s38_s15  }
  0x10   : > { %p630_p11 = por %p81_p10, %p51_p3  ;;  %s101_s22 = sand.u32 1, %s545_s8  }
  0x11   : > { %s371_s23 = sshll.u32 %s101_s22, 4  ;;  %s381_s24 = sshll.u32 %s553_s10, 8 }
  0x12   : > { %s726_s21 = scalar_select %p630_p11, 1, 0 }
  0x13   : > { %s113_s27 = scalar_lea.hbm %s721_s0, %s381_s24  ;;  %s105_s28 = scalar_lea.vmem [#allocation2], %s371_s23 }
  0x14   : > { %s115_s29 = sshll.u32 %s105_s28, 4  ;;  %p643_p0 = pnand %p394_p13, %p613_p4  ;;  %s116_s29 = int_to_ptr.vmem [resolvable:$true] %s115_s29 }
  0x15   : > { %p374_p1 = scmp.ge.s32.totalorder %s557_s11, 1  ;;  %p120_p2 = scmp.lt.s32.totalorder %s557_s11, 3 }
  0x16   : > { %s102_s2 = scalar_lea.sflag [#allocation3], %s101_s22  ;;  %p451_p3 = pneg %p643_p0 }
  0x17   : > { %s462_s3 = scalar_lea.vmem %s116_s29, 256  ;;  %s559_s4 = smov [#allocation2]  }
  0x18   : > { %p463_p5 = scmp.ne.s32.totalorder %s116_s29, %s462_s3  ;;  %s467_s5 = sshll.u32 %s559_s4, 4  ;;  %s468_s5 = int_to_ptr.vmem [resolvable:$false] %s467_s5 }
  0x19   : > { %s469_s12 = scalar_lea.vmem %s468_s5, 512  ;;  %p470_p10 = scmp.lt.s32.totalorder %s116_s29, %s468_s5 }
  0x1a   : > { %p465_p6 = pnand %p463_p5, %p451_p3  ;;  %p471_p12 = scmp.lt.s32.totalorder %s469_s12, %s462_s3 }
  0x1c   : > { %p466_p7 = pneg %p465_p6  ;;  %p472_p4 = por %p471_p12, %p470_p10 }
  0x1e   : > { %p473_p13 = pnand %p472_p4, %p466_p7 }
  0x20   : > { %476 = shalt.err (!%p473_p13)
}
  0x21   : > { %389 = dma.hbm_to_vmem [thread:$0]  (!%p643_p0), %s113_s27, 256, %s116_s29, %s102_s2  }
  0x22   : > { %p121_p11 = pnand %p374_p1, %p120_p2 }
  0x23   : > { %s658_s13 = sand.u32 (!%p121_p11), 1, %s541_s7  }
  0x24   : > { %124 = sbr.rel (%p121_p11) target bundleno = 291 (0x123), region = 24  ;;  %s375_s15 = sshll.u32 (!%p121_p11), %s658_s13, 4 }
  0x25   : > { %s127_s16 = scalar_lea.sflag (!%p121_p11), [#allocation3], %s658_s13  ;;  %s130_s17 = scalar_lea.vmem (!%p121_p11), [#allocation2], %s375_s15 }
  0x29   : > { %528 = dma.done.wait (%p619_p8), %s127_s16, 256  }
  0x2a   : > { %530 = vsyncadd (%p619_p8), %s127_s16, 4294967040  ;;  %s376_s22 = sshll.u32 %s658_s13, 3  ;;  %vm154_vm0 = vcmask 64512   ;;  %v560_v0 = vmov 0.0   ;;  %v157_v1 = vld [vmem:[%s130_s17 + $0x8] sm:$0xff]  ;;  %v156_v2 = vld [vmem:[%s130_s17] sm:$0xff] }
  0x2b   : > { %s667_s23 = scalar_lea.vmem [#allocation5], %s376_s22  ;;  %v164_v3 = vrot.slane %v157_v1, 4  ;;  %v171_v4 = vmul.f32 %v157_v1, %v157_v1  ;;  %v158_v5 = vrot.slane %v156_v2, 4  ;;  %v170_v6 = vmul.f32 %v156_v2, %v156_v2  ;;  %s378_s18 = sshll.u32 %s549_s9, 7 }
  0x2c   : > { %155 = vst.msk [vmem:[%s667_s23] sm:$0xff] %vm154_vm0, %v560_v0  ;;  %s286_s24 = sshll.u32 %s667_s23, 4  ;;  %s677_s27 = scalar_lea.hbm %s722_s1, %s378_s18  ;;  %s287_s24 = int_to_ptr.vmem [resolvable:$true] %s286_s24 }
  0x2d   : > { %v165_v7 = vadd.f32 %v164_v3, %v157_v1  ;;  %v178_v8 = vrot.slane %v171_v4, 4  ;;  %v159_v9 = vadd.f32 %v158_v5, %v156_v2  ;;  %v172_v10 = vrot.slane %v170_v6, 4  ;;  %s273_s28 = scalar_lea.sflag [#allocation4], %s658_s13  ;;  %s477_s29 = scalar_lea.vmem %s287_s24, 128 }
  0x2e   : > { %p478_p8 = scmp.ne.s32.totalorder %s287_s24, %s477_s29  ;;  %s561_s30 = smov [#allocation5]  }
  0x2f   : > { %v166_v11 = vrot.slane %v165_v7, 2  ;;  %v179_v12 = vadd.f32 %v178_v8, %v171_v4  ;;  %v160_v13 = vrot.slane %v159_v9, 2  ;;  %v173_v14 = vadd.f32 %v172_v10, %v170_v6  ;;  %s481_s9 = sshll.u32 %s561_s30, 4  ;;  %s482_s9 = int_to_ptr.vmem [resolvable:$false] %s481_s9 }
  0x30   : > { %p479_p11 = pnand %p478_p8, %p623_p9  ;;  %s483_s2 = scalar_lea.vmem %s482_s9, 256 }
  0x31   : > { %v167_v15 = vadd.f32 %v166_v11, %v165_v7  ;;  %v180_v16 = vrot.slane %v179_v12, 2  ;;  %v161_v17 = vadd.f32 %v160_v13, %v159_v9  ;;  %v174_v18 = vrot.slane %v173_v14, 2  ;;  %p484_p0 = scmp.lt.s32.totalorder %s287_s24, %s482_s9  ;;  %p485_p1 = scmp.lt.s32.totalorder %s483_s2, %s477_s29 }
  0x32   : > { %p480_p12 = pneg %p479_p11 }
  0x33   : > { %v168_v19 = vrot.slane %v167_v15, 1  ;;  %v181_v20 = vadd.f32 %v180_v16, %v179_v12  ;;  %v162_v21 = vrot.slane %v161_v17, 1  ;;  %v175_v22 = vadd.f32 %v174_v18, %v173_v14  ;;  %v198_v43 = vld [vmem:[%s667_s23] sm:$0xff]  ;;  %p486_p2 = por %p485_p1, %p484_p0 }
  0x35   : > { %v169_v23 = vadd.f32 %v168_v19, %v167_v15  ;;  %v182_v24 = vrot.slane %v181_v20, 1  ;;  %v163_v25 = vadd.f32 %v162_v21, %v161_v17  ;;  %v176_v26 = vrot.slane %v175_v22, 1  ;;  %p487_p3 = pnand %p486_p2, %p480_p12 }
  0x37   : > { %v183_v27 = vadd.f32 %v182_v24, %v181_v20  ;;  %v185_v28 = vmul.f32 0.125, %v169_v23  ;;  %v177_v29 = vadd.f32 %v176_v26, %v175_v22  ;;  %v184_v30 = vmul.f32 0.125, %v163_v25 }
  0x39   : > { %v187_v31 = vmul.f32 %v185_v28, %v169_v23  ;;  %v186_v32 = vmul.f32 %v184_v30, %v163_v25  ;;  %v193_v37 = vsub.f32 %v157_v1, %v185_v28  ;;  %v192_v38 = vsub.f32 %v156_v2, %v184_v30 }
  0x3b   : > { %v189_v33 = vsub.f32 %v183_v27, %v187_v31  ;;  %v188_v34 = vsub.f32 %v177_v29, %v186_v32 }
  0x3d   : > { %v191_v35 = vmul.f32 0.14285715, %v189_v33  ;;  %v190_v36 = vmul.f32 0.14285715, %v188_v34 }
  0x3f   : > { %445 = vrsqrt.f32 %v191_v35 }
  0x40   : > { %447 = vrsqrt.f32 %v190_v36 }
  0x4c   : > { %v446_v39 = vpop.eup %445 }
  0x4d   : > { %v448_v40 = vpop.eup %447  ;;  %v197_v41 = vmul.f32 %v446_v39, %v193_v37 }
  0x4e   : > { %v196_v42 = vmul.f32 %v448_v40, %v192_v38 }
  0x4f   : > { %229 = vmatprep.subr.mxu0 %v197_v41  ;;  %263 = vmatprep.mubr.f32.mxu0 %v197_v41 }
  0x50   : > { %230 = vmatpush1.xpose.msra.mxu0 %v196_v42 }
  0x53   : > { %264 = vmatmul.mubr.f32.vlgmr.msra.gmra.mxu0 %v196_v42 }
 0x113   : > { %v265_v44 = vpop.f32.mrf.mxu0 }
 0x114   : > { %v269_v45 = vadd.f32 %v265_v44, %v198_v43 }
 0x115   : > { %v267_v46 = vpop.f32.mrf.mxu0 }
 0x116   : > { %271 = vst.msk [vmem:[%s667_s23] sm:$0xff] %vm154_vm0, %v269_v45 }
 0x117   : > { %490 = shalt.err (!%p487_p3)
}
 0x118   : > { %s491_s3 = scalar_lea.hbm %s677_s27, 128  ;;  %s495_s12 = scalar_lea.hbm %s722_s1, 256 }
 0x119   : > { %p492_p5 = scmp.ne.s32.totalorder %s677_s27, %s491_s3  ;;  %p496_p10 = scmp.lt.s32.totalorder %s677_s27, %s722_s1 }
 0x11a   : > { %p497_p4 = scmp.lt.s32.totalorder %s495_s12, %s491_s3 }
 0x11b   : > { %p493_p6 = pnand %p492_p5, %p623_p9 }
 0x11c   : > { %p498_p13 = por %p497_p4, %p496_p10 }
 0x11d   : > { %p494_p7 = pneg %p493_p6 }
 0x11f   : > { %p499_p8 = pnand %p498_p13, %p494_p7 }
 0x121   : > { %502 = shalt.err (!%p499_p8)
}
 0x122   : > { %384 = dma.vmem_to_hbm [thread:$0]  (%p623_p9), %s287_s24, 128, %s677_s27, %s273_s28  }
 0x123 PF: > { %s298_s16 = sand.u32 1, %s537_s6   ;;  %p728_p11 = scmp.ne.s32.totalorder %s726_s21, 0 }
 0x124   : > { %p729_p12 = scmp.ge.s32.totalorder %s557_s11, 2  ;;  %s299_s17 = scalar_lea.sflag [#allocation4], %s298_s16 }
 0x126   : > { %p391_p0 = pnand %p729_p12, %p728_p11 }
 0x128   : > { %p392_p1 = pneg %p391_p0 }
 0x12a   : > { %532 = dma.done.wait (%p392_p1), %s299_s17, 128  }
 0x12b   : > { %534 = vsyncadd (%p392_p1), %s299_s17, 4294967168  ;;  %s17_s11 = sadd.s32 1, %s557_s11   ;;  %s730_s6 = smov %s541_s7 }
 0x12c   : > { %p14_p2 = scmp.ge.s32.totalorder %s17_s11, 4   ;;  %s731_s7 = smov %s545_s8 }
 0x12d   : > { %s732_s8 = smov %s628_s20  ;;  %s733_s9 = smov %s553_s10 }
 0x12e   : > { %s734_s10 = smov %s736_s14  ;;  %16 = sbr.rel (!%p14_p2) target bundleno = 6 (0x6), region = 73 }
 0x133   :  { %304 = vsyncpa [#allocation3], 1 }
 0x134   :  { %306 = vsyncpa [#allocation3 + $0x1], 1 }
 0x135   :  { %307 = vsyncpa [#allocation4], 1 }
 0x136   :  { %309 = vsyncpa [#allocation4 + $0x1], 1 }

</bundles_post_ra>
